<compile_context>
chip_gen: v6e
topology: v6e:2x2x1
jax: 0.10.0
libtpu: 0.0.40
codegen_flags: <defaults>
</compile_context>

<pallas_src>
import jax
import jax.numpy as jnp
from jax.experimental import pallas as pl
from jax.experimental.pallas import tpu as pltpu

_LANES = 128
# Per-tile footprint target: 4 MiB per buffer -> with double-buffered input
# and output that's 16 MiB of VMEM, safely under the scoped limit on
# v5e (raised via vmem_limit_bytes), v6e, and v7x (64 MiB physical).
_TILE_BYTES = 4 * 1024 * 1024


def _copy_kernel(x_ref, o_ref):
    # Pure pass-through of the current lane-dense (tile_rows, lane_width) tile.
    o_ref[...] = x_ref[...]


def _pallas_identity(embeddings: jax.Array) -> jax.Array:
    """Identity copy of `embeddings` at the HBM roofline.

    Flattens to a lane-dense (rows, 128) layout (metadata-only reshape for a
    contiguous array) so stores are full unmasked `vst`, and uses the largest
    tile that comfortably fits VMEM so per-grid-step overhead is amortized.
    """
    orig_shape = embeddings.shape
    dtype = embeddings.dtype
    itemsize = jnp.dtype(dtype).itemsize
    n = int(embeddings.size)

    if n % _LANES == 0:
        rows = n // _LANES
        lane_width = _LANES
    else:
        # Fallback for odd sizes: single full-array block (block == full dims
        # satisfies the (8,128) rule).  # TODO(synk): pad to a 128 multiple if
        # odd-sized embeddings ever show up on the hot path.
        rows = 1
        lane_width = n
    x2d = embeddings.reshape(rows, lane_width)

    # Largest sublane tile (multiple of 8 rows, also a multiple of 16/32 for
    # bf16/int8 sublane packing) bounded by the per-buffer byte budget.
    max_tile_rows = max(8, (_TILE_BYTES // (lane_width * itemsize)) // 8 * 8)
    if rows <= max_tile_rows:
        tile_rows = rows          # whole array in one block (== full dims)
        grid = (1,)
    else:
        tile_rows = max_tile_rows
        grid = (pl.cdiv(rows, tile_rows),)  # Pallas masks the ragged tail

    out2d = pl.pallas_call(
        _copy_kernel,
        out_shape=jax.ShapeDtypeStruct((rows, lane_width), dtype),
        grid=grid,
        in_specs=[pl.BlockSpec((tile_rows, lane_width), lambda r: (r, 0))],
        out_specs=pl.BlockSpec((tile_rows, lane_width), lambda r: (r, 0)),
        compiler_params=pltpu.CompilerParams(
            # Disjoint output tiles -> safe to shard across TCs on v7x; it is
            # a no-op on single-TC v5e/v6e.
            dimension_semantics=("parallel",),
            # 2 buffers x (in + out) x 4 MiB = 16 MiB; 32 MiB gives headroom
            # everywhere (and raises v5e's 16 MiB default scoped limit).
            vmem_limit_bytes=32 * 1024 * 1024,
        ),
    )(x2d)

    return out2d.reshape(orig_shape)


class CustomEmbeddingLayerPallas:
    """JAX/Pallas mirror of the PyTorch CustomEmbeddingLayer."""

    req = None  # class-level static embeddings, set before forward

    def __init__(self, hidden_size: int):
        self.embedding_dim = hidden_size

    def forward(self, _):
        embeddings = CustomEmbeddingLayerPallas.req
        if embeddings is None:
            raise ValueError("No input found")
        else:
            print("Input found!")
        assert embeddings.shape[-1] == self.embedding_dim, (
            f"Expected embedding_dim={self.embedding_dim}, "
            f"got {embeddings.shape[-1]}"
        )
        # Identity pass-through via the Pallas kernel (the "hot path").
        return _pallas_identity(embeddings)

    __call__ = forward


if __name__ == "__main__":
    # Small deterministic shapes: batch=2, seq=8, hidden=32.
    B, S, H = 2, 8, 32
    key = jax.random.PRNGKey(0)
    embeddings = jax.random.normal(key, (B, S, H), dtype=jnp.float32)

    # Module ignores its positional input; set the static `req` instead.
    CustomEmbeddingLayerPallas.req = embeddings
    layer = CustomEmbeddingLayerPallas(hidden_size=H)

    dummy_input = jnp.zeros((B, S), dtype=jnp.int32)  # ignored by forward
    out = layer(dummy_input)
    out = jax.block_until_ready(out)

    # Verify exact pass-through semantics.
    assert out.shape == embeddings.shape
    assert out.dtype == embeddings.dtype
    assert bool(jnp.all(out == embeddings))

    print("KERNEL_OK")
</pallas_src>

<mosaic_0001>
module attributes {stable_mosaic.version = 11 : i64} {
  func.func @_copy_kernel(%arg0: i32, %arg1: memref<4x128xf32, #tpu.memory_space<vmem>>, %arg2: memref<4x128xf32, #tpu.memory_space<vmem>>) attributes {dimension_semantics = [#tpu.dimension_semantics<parallel>], iteration_bounds = array<i64: 1>, scalar_prefetch = 0 : i64, scratch_operands = 0 : i64, tpu.core_type = #tpu.core_type<tc>, window_params = [{transform_indices = @transform_0, window_bounds = array<i64: 4, 128>}, {transform_indices = @transform_1, window_bounds = array<i64: 4, 128>}]} {
    %c0 = arith.constant 0 : index
    %c0_0 = arith.constant 0 : index
    %0 = vector.load %arg1[%c0, %c0_0] : memref<4x128xf32, #tpu.memory_space<vmem>>, vector<4x128xf32>
    %c0_1 = arith.constant 0 : index
    %c0_2 = arith.constant 0 : index
    %1 = vector.load %arg2[%c0_1, %c0_2] : memref<4x128xf32, #tpu.memory_space<vmem>>, vector<4x128xf32>
    tpu.vector_store %arg2[%c0_1, %c0_2], %0 {strides = array<i32>} : memref<4x128xf32, #tpu.memory_space<vmem>>, vector<4x128xf32>,
    return
  }
  func.func @transform_0(%arg0: i32) -> (i32, i32) {
    %c0_i32 = arith.constant 0 : i32
    %c0_i32_0 = arith.constant 0 : i32
    return %arg0, %c0_i32 : i32, i32
  }
  func.func @transform_1(%arg0: i32) -> (i32, i32) {
    %c0_i32 = arith.constant 0 : i32
    %c0_i32_0 = arith.constant 0 : i32
    return %arg0, %c0_i32 : i32, i32
  }
}

</mosaic_0001>

<bundles_post_ra>
// kernel: tpu_custom_call.1
= control target key start
LH: loop header
LB: loop body
LE: loop exit
PB: predicated region body
PF: predicated region fallthrough
CT: control target
= control target key end

     0   :  { %6 = vsyncpa [#allocation3], 0  ;;  %s102_s0 = inlined_call_operand.hbm [shape: f32[4,128], index: 0, kind: input, shape index: {}]   ;;  %s103_s1 = inlined_call_operand.hbm [shape: f32[4,128], index: 1, kind: output, shape index: {}]  }
   0x1   :  { %7 = vsyncpa [#allocation4], 0  ;;  %s84_s6 = smov [#allocation2]  }
   0x2   :  { %s14_s7 = sshll.u32 %s84_s6, 4  ;;  %s15_s7 = int_to_ptr.vmem [resolvable:$true] %s14_s7 }
   0x3   :  { %s48_s8 = scalar_lea.vmem %s15_s7, 64  ;;  %p53_p1 = scmp.lt.s32.totalorder %s15_s7, %s15_s7 }
   0x4   :  { %p49_p0 = scmp.ne.s32.totalorder %s15_s7, %s48_s8  ;;  %p54_p2 = scmp.lt.s32.totalorder %s48_s8, %s48_s8 }
   0x6   :  { %p55_p3 = por %p54_p2, %p53_p1 }
   0x8   :  { %p56_p4 = pnand %p55_p3, %p49_p0 }
   0xa   :  { %59 = shalt.err (!%p56_p4)
}
   0xb   :  { %17 = dma.hbm_to_vmem [thread:$0]  %s102_s0, 64, %s15_s7, [#allocation3]  }
   0xc   :  { %80 = dma.done.wait [#allocation3], 64  }
   0xd   :  { %81 = vsyncadd [#allocation3], 4294967232  ;;  %s85_s11 = smov [#allocation5]   ;;  %v21_v0 = vld [vmem:[#allocation2] sm:$0xf] }
   0xe   :  { %s29_s12 = sshll.u32 %s85_s11, 4  ;;  %22 = vst [vmem:[#allocation5] sm:$0xf] %v21_v0  ;;  %s30_s12 = int_to_ptr.vmem [resolvable:$true] %s29_s12 }
   0xf   :  { %s60_s13 = scalar_lea.vmem %s30_s12, 64  ;;  %p65_p6 = scmp.lt.s32.totalorder %s30_s12, %s30_s12 }
  0x10   :  { %p61_p5 = scmp.ne.s32.totalorder %s30_s12, %s60_s13  ;;  %p66_p7 = scmp.lt.s32.totalorder %s60_s13, %s60_s13 }
  0x12   :  { %p67_p8 = por %p66_p7, %p65_p6 }
  0x14   :  { %p68_p9 = pnand %p67_p8, %p61_p5 }
  0x16   :  { %71 = shalt.err (!%p68_p9)
}
  0x17   :  { %32 = dma.vmem_to_hbm [thread:$0]  %s30_s12, 64, %s103_s1, [#allocation4]  }
  0x18   :  { %82 = dma.done.wait [#allocation4], 64  }
  0x19   :  { %83 = vsyncadd [#allocation4], 4294967232 }
  0x1a   :  { %36 = vsyncpa [#allocation3], 1 }
  0x1b   :  { %37 = vsyncpa [#allocation4], 1 }

</bundles_post_ra>
